<compile_context>
chip_gen: v7x
topology: tpu7x:2x2x1
jax: 0.10.0
libtpu: 0.0.40
codegen_flags: <defaults>
</compile_context>

<pallas_src>
import jax
import jax.numpy as jnp
from jax.experimental import pallas as pl
from jax.experimental.pallas import tpu as pltpu


def _crosspatch_kernel(x_ref, w_ref, bias_ref, a1_ref, b1_ref, a2_ref, b2_ref,
                       o_ref):
    # x_ref / o_ref: (L, T) lane-dense tile of the flattened (L, N*C) input.
    # w_ref: (L, L); bias_ref: (L, 1); a*/b* refs: (1, T) per-lane affine consts.
    x = x_ref[...]
    z = x * a1_ref[...] + b1_ref[...]                 # folded Aff1 * Aff2 scale/shift
    y = jnp.dot(w_ref[...], z,
                preferred_element_type=jnp.float32)   # token mixing over L on the MXU
    y = y + bias_ref[...] * a2_ref[...] + b2_ref[...] # bias*alpha2 + beta2 (outer bcast)
    o_ref[...] = (x + y).astype(o_ref.dtype)


def _pick_lane_tile(total_lanes, L, itemsize, block_budget_bytes=4 << 20):
    """Largest lane tile that is a multiple of 128, divides total_lanes, and keeps
    one x-block + one out-block within block_budget_bytes (double-buffering then
    stays well inside the VMEM limit on v5e/v6e/v7x)."""
    if total_lanes % 128 != 0:
        return total_lanes                      # full-array block: legal for any size
    max_t = max(128, (block_budget_bytes // (2 * L * itemsize)) // 128 * 128)
    best = 128
    t = 256
    while t <= min(total_lanes, max_t):
        if total_lanes % t == 0:
            best = t
        t += 128
    # Prefer >= 2 grid steps so both TensorCores get work on v7x megacore.
    if best == total_lanes and total_lanes % 256 == 0:
        best = total_lanes // 2
    return best


def crosspatch(x, w, bias, alpha1, beta1, alpha2, beta2):
    """x: (N, L, C). w: (L, L) (nn.Linear(length, length).weight), bias: (L,).
    alpha*/beta*: (C,) Aff parameters. Returns (N, L, C) in x.dtype."""
    N, L, C = x.shape
    dtype = x.dtype
    total = N * C
    itemsize = jnp.dtype(dtype).itemsize

    # Lane-dense layout: (N, L, C) -> (L, N*C). One XLA transpose in HBM.
    xt = jnp.transpose(x, (1, 0, 2)).reshape(L, total)

    # Algebraic folding of the two Aff layers + Linear bias:
    #   out = x + W @ (alpha1*alpha2 * x + beta1*alpha2) + bias*alpha2 + beta2
    a1f = jnp.tile(alpha1 * alpha2, N).reshape(1, total).astype(dtype)
    b1f = jnp.tile(beta1 * alpha2, N).reshape(1, total).astype(dtype)
    a2f = jnp.tile(alpha2, N).reshape(1, total).astype(dtype)
    b2f = jnp.tile(beta2, N).reshape(1, total).astype(dtype)
    bias2d = bias.reshape(L, 1).astype(dtype)
    w = w.astype(dtype)

    T = _pick_lane_tile(total, L, itemsize)
    grid = (total // T,)

    def lane_spec():
        return pl.BlockSpec((1, T), lambda j: (0, j))

    def const_spec(shape):
        return pl.BlockSpec(shape, lambda j: (0, 0))

    flops = 2 * L * L * total + 6 * L * total
    bytes_accessed = (2 * L * total + L * L + 4 * total + L) * itemsize

    out_flat = pl.pallas_call(
        _crosspatch_kernel,
        out_shape=jax.ShapeDtypeStruct((L, total), dtype),
        grid_spec=pltpu.PrefetchScalarGridSpec(
            num_scalar_prefetch=0,
            grid=grid,
            in_specs=[
                pl.BlockSpec((L, T), lambda j: (0, j)),   # x tile (lane-dense)
                const_spec((L, L)),                       # W
                const_spec((L, 1)),                       # Linear bias
                lane_spec(),                              # alpha1*alpha2
                lane_spec(),                              # beta1*alpha2
                lane_spec(),                              # alpha2
                lane_spec(),                              # beta2
            ],
            out_specs=pl.BlockSpec((L, T), lambda j: (0, j)),
        ),
        compiler_params=pltpu.CompilerParams(
            dimension_semantics=("parallel",),
            vmem_limit_bytes=48 * 1024 * 1024,
        ),
        cost_estimate=pl.CostEstimate(
            flops=flops, transcendentals=0, bytes_accessed=bytes_accessed),
    )(xt, w, bias2d, a1f, b1f, a2f, b2f)

    # (L, N*C) -> (N, L, C)
    return out_flat.reshape(L, N, C).transpose(1, 0, 2)


def crosspatch_ref(x, w, bias, alpha1, beta1, alpha2, beta2):
    # Pure-JAX reference matching the PyTorch forward exactly.
    z = x * alpha1[None, None, :] + beta1[None, None, :]          # Aff1
    zt = jnp.transpose(z, (0, 2, 1))                              # N L C -> N C L
    yt = jnp.einsum('ncl,ml->ncm', zt, w) + bias[None, None, :]   # Linear(length, length)
    y = jnp.transpose(yt, (0, 2, 1))                              # N C L -> N L C
    y = y * alpha2[None, None, :] + beta2[None, None, :]          # Aff2
    return x + y


def _run_case(key, N, L, C):
    kx, kw, kb, ka1, kb1, ka2, kb2 = jax.random.split(key, 7)
    x = jax.random.normal(kx, (N, L, C), dtype=jnp.float32)
    w = jax.random.normal(kw, (L, L), dtype=jnp.float32) * 0.1
    bias = jax.random.normal(kb, (L,), dtype=jnp.float32) * 0.1
    alpha1 = 1.0 + 0.1 * jax.random.normal(ka1, (C,), dtype=jnp.float32)
    beta1 = 0.1 * jax.random.normal(kb1, (C,), dtype=jnp.float32)
    alpha2 = 1.0 + 0.1 * jax.random.normal(ka2, (C,), dtype=jnp.float32)
    beta2 = 0.1 * jax.random.normal(kb2, (C,), dtype=jnp.float32)

    out = jax.block_until_ready(
        crosspatch(x, w, bias, alpha1, beta1, alpha2, beta2))
    ref = crosspatch_ref(x, w, bias, alpha1, beta1, alpha2, beta2)
    assert out.shape == (N, L, C)
    assert jnp.allclose(out, ref, atol=1e-4, rtol=1e-4), \
        f"mismatch vs reference at shape {(N, L, C)}"


if __name__ == "__main__":
    key = jax.random.PRNGKey(0)
    k1, k2 = jax.random.split(key, 2)

    # Small shape matching the module's toy config (N*C < 128 -> single full block).
    _run_case(k1, N=2, L=8, C=32)
    # Lane-aligned shape (N*C = 512, multiple of 128) exercising the tiled,
    # multi-step "parallel" grid path.
    _run_case(k2, N=4, L=16, C=128)

    print("KERNEL_OK")
</pallas_src>

<mosaic_0001>
module attributes {stable_mosaic.version = 11 : i64} {
  func.func @_crosspatch_kernel(%arg0: i32, %arg1: memref<8x64xf32, #tpu.memory_space<vmem>>, %arg2: memref<8x8xf32, #tpu.memory_space<vmem>>, %arg3: memref<8x1xf32, #tpu.memory_space<vmem>>, %arg4: memref<1x64xf32, #tpu.memory_space<vmem>>, %arg5: memref<1x64xf32, #tpu.memory_space<vmem>>, %arg6: memref<1x64xf32, #tpu.memory_space<vmem>>, %arg7: memref<1x64xf32, #tpu.memory_space<vmem>>, %arg8: memref<8x64xf32, #tpu.memory_space<vmem>>) attributes {dimension_semantics = [#tpu.dimension_semantics<parallel>], iteration_bounds = array<i64: 1>, scalar_prefetch = 0 : i64, scratch_operands = 0 : i64, tpu.core_type = #tpu.core_type<tc>, window_params = [{transform_indices = @transform_0, window_bounds = array<i64: 8, 64>}, {pipeline_mode = #tpu.pipeline_mode<synchronous>, transform_indices = @transform_1, window_bounds = array<i64: 8, 8>}, {pipeline_mode = #tpu.pipeline_mode<synchronous>, transform_indices = @transform_2, window_bounds = array<i64: 8, 1>}, {transform_indices = @transform_3, window_bounds = array<i64: 1, 64>}, {transform_indices = @transform_4, window_bounds = array<i64: 1, 64>}, {transform_indices = @transform_5, window_bounds = array<i64: 1, 64>}, {transform_indices = @transform_6, window_bounds = array<i64: 1, 64>}, {transform_indices = @transform_7, window_bounds = array<i64: 8, 64>}]} {
    %c0 = arith.constant 0 : index
    %c0_0 = arith.constant 0 : index
    %0 = vector.load %arg1[%c0, %c0_0] : memref<8x64xf32, #tpu.memory_space<vmem>>, vector<8x64xf32>
    %c0_1 = arith.constant 0 : index
    %c0_2 = arith.constant 0 : index
    %1 = vector.load %arg4[%c0_1, %c0_2] : memref<1x64xf32, #tpu.memory_space<vmem>>, vector<1x64xf32>
    %2 = vector.broadcast %1 : vector<1x64xf32> to vector<8x64xf32>
    %3 = arith.mulf %0, %2 : vector<8x64xf32>
    %c0_3 = arith.constant 0 : index
    %c0_4 = arith.constant 0 : index
    %4 = vector.load %arg5[%c0_3, %c0_4] : memref<1x64xf32, #tpu.memory_space<vmem>>, vector<1x64xf32>
    %5 = vector.broadcast %4 : vector<1x64xf32> to vector<8x64xf32>
    %6 = arith.addf %3, %5 : vector<8x64xf32>
    %c0_5 = arith.constant 0 : index
    %c0_6 = arith.constant 0 : index
    %7 = vector.load %arg2[%c0_5, %c0_6] : memref<8x8xf32, #tpu.memory_space<vmem>>, vector<8x8xf32>
    %cst = arith.constant dense<0.000000e+00> : vector<8x64xf32>
    %8 = tpu.matmul %7, %6, %cst {dimension_numbers = #tpu.dot_dimension_numbers<[1], [0], [0], [1], [0, 0, 1, 1], [], []>} : vector<8x8xf32>, vector<8x64xf32>, vector<8x64xf32> -> vector<8x64xf32>
    %c0_7 = arith.constant 0 : index
    %c0_8 = arith.constant 0 : index
    %9 = vector.load %arg3[%c0_7, %c0_8] : memref<8x1xf32, #tpu.memory_space<vmem>>, vector<8x1xf32>
    %c0_9 = arith.constant 0 : index
    %c0_10 = arith.constant 0 : index
    %10 = vector.load %arg6[%c0_9, %c0_10] : memref<1x64xf32, #tpu.memory_space<vmem>>, vector<1x64xf32>
    %11 = vector.broadcast %9 : vector<8x1xf32> to vector<8x64xf32>
    %12 = vector.broadcast %10 : vector<1x64xf32> to vector<8x64xf32>
    %13 = arith.mulf %11, %12 : vector<8x64xf32>
    %14 = arith.addf %8, %13 : vector<8x64xf32>
    %c0_11 = arith.constant 0 : index
    %c0_12 = arith.constant 0 : index
    %15 = vector.load %arg7[%c0_11, %c0_12] : memref<1x64xf32, #tpu.memory_space<vmem>>, vector<1x64xf32>
    %16 = vector.broadcast %15 : vector<1x64xf32> to vector<8x64xf32>
    %17 = arith.addf %14, %16 : vector<8x64xf32>
    %18 = arith.addf %0, %17 : vector<8x64xf32>
    %c0_13 = arith.constant 0 : index
    %c0_14 = arith.constant 0 : index
    %19 = vector.load %arg8[%c0_13, %c0_14] : memref<8x64xf32, #tpu.memory_space<vmem>>, vector<8x64xf32>
    tpu.vector_store %arg8[%c0_13, %c0_14], %18 {strides = array<i32>} : memref<8x64xf32, #tpu.memory_space<vmem>>, vector<8x64xf32>,
    return
  }
  func.func @transform_0(%arg0: i32) -> (i32, i32) {
    %c0_i32 = arith.constant 0 : i32
    %c0_i32_0 = arith.constant 0 : i32
    return %c0_i32, %arg0 : i32, i32
  }
  func.func @transform_1(%arg0: i32) -> (i32, i32) {
    %c0_i32 = arith.constant 0 : i32
    %c0_i32_0 = arith.constant 0 : i32
    %c0_i32_1 = arith.constant 0 : i32
    return %c0_i32, %c0_i32_0 : i32, i32
  }
  func.func @transform_2(%arg0: i32) -> (i32, i32) {
    %c0_i32 = arith.constant 0 : i32
    %c0_i32_0 = arith.constant 0 : i32
    %c0_i32_1 = arith.constant 0 : i32
    return %c0_i32, %c0_i32_0 : i32, i32
  }
  func.func @transform_3(%arg0: i32) -> (i32, i32) {
    %c0_i32 = arith.constant 0 : i32
    %c0_i32_0 = arith.constant 0 : i32
    return %c0_i32, %arg0 : i32, i32
  }
  func.func @transform_4(%arg0: i32) -> (i32, i32) {
    %c0_i32 = arith.constant 0 : i32
    %c0_i32_0 = arith.constant 0 : i32
    return %c0_i32, %arg0 : i32, i32
  }
  func.func @transform_5(%arg0: i32) -> (i32, i32) {
    %c0_i32 = arith.constant 0 : i32
    %c0_i32_0 = arith.constant 0 : i32
    return %c0_i32, %arg0 : i32, i32
  }
  func.func @transform_6(%arg0: i32) -> (i32, i32) {
    %c0_i32 = arith.constant 0 : i32
    %c0_i32_0 = arith.constant 0 : i32
    return %c0_i32, %arg0 : i32, i32
  }
  func.func @transform_7(%arg0: i32) -> (i32, i32) {
    %c0_i32 = arith.constant 0 : i32
    %c0_i32_0 = arith.constant 0 : i32
    return %c0_i32, %arg0 : i32, i32
  }
}

</mosaic_0001>

<bundles_post_ra>
// kernel: tpu_custom_call.1
= control target key start
LH: loop header
LB: loop body
LE: loop exit
PB: predicated region body
PF: predicated region fallthrough
CT: control target
= control target key end

     0   :  { %12 = vsyncpa [#allocation3], 0  ;;  %s324_s0 = inlined_call_operand.vmem [shape: f32[8,64], index: 0, kind: input, shape index: {}]   ;;  %s325_s1 = inlined_call_operand.hbm [shape: f32[8,8], index: 1, kind: input, shape index: {}]   ;;  %s326_s2 = inlined_call_operand.vmem [shape: f32[8,1], index: 2, kind: input, shape index: {}]   ;;  %s327_s3 = inlined_call_operand.vmem [shape: f32[1,64], index: 3, kind: input, shape index: {}]   ;;  %s328_s4 = inlined_call_operand.vmem [shape: f32[1,64], index: 4, kind: input, shape index: {}]   ;;  %s329_s5 = inlined_call_operand.vmem [shape: f32[1,64], index: 5, kind: input, shape index: {}]   ;;  %s330_s6 = inlined_call_operand.vmem [shape: f32[1,64], index: 6, kind: input, shape index: {}]   ;;  %s331_s7 = inlined_call_operand.hbm [shape: f32[8,64], index: 7, kind: output, shape index: {}]  }
   0x1   :  { %13 = vsyncpa [#allocation4], 0  ;;  %s237_s24 = smov [#allocation2]   ;;  %s189_s28 = scalar_lea.hbm %s325_s1, 128 }
   0x2   :  { %s22_s25 = sshll.u32 %s237_s24, 4  ;;  %p190_p0 = scmp.ne.s32.totalorder %s325_s1, %s189_s28  ;;  %s23_s25 = int_to_ptr.vmem [resolvable:$true] %s22_s25 }
   0x3   :  { %p193_p1 = scmp.lt.u32.totalorder %s189_s28, %s325_s1 }
   0x5   :  { %p195_p2 = pnand %p193_p1, %p190_p0 }
   0x7   :  { %198 = shalt.err (!%p195_p2)
}
   0x8   :  { %s199_s10 = scalar_lea.vmem %s23_s25, 128  ;;  %p204_p4 = scmp.lt.s32.totalorder %s23_s25, %s23_s25 }
   0x9   :  { %p200_p3 = scmp.ne.s32.totalorder %s23_s25, %s199_s10  ;;  %p205_p5 = scmp.lt.s32.totalorder %s199_s10, %s199_s10 }
   0xb   :  { %p206_p6 = por %p205_p5, %p204_p4 }
   0xd   :  { %p207_p7 = pnand %p206_p6, %p200_p3 }
   0xf   :  { %210 = shalt.err (!%p207_p7)
}
  0x10   :  { %25 = dma.hbm_to_vmem [thread:$0]  %s325_s1, 128, %s23_s25, [#allocation3]  }
  0x11   :  { %233 = dma.done.wait [#allocation3], 128  }
  0x12   :  { %234 = vsyncadd [#allocation3], 4294967168  ;;  %v238_v0 = vmov 0.0   ;;  %vm239_vm0 = vmmov 0   ;;  %v240_v1 = vmov 0   ;;  %v39_v2 = vld [vmem:[%s324_s0] sm:$0xff] }
  0x13   :  { %178 = vmatprep.subr.mxu0 %v238_v0  ;;  %180 = vmatprep.mubr.msk.f32.mxu0 %vm239_vm0, %v238_v0  ;;  %v171_v3 = vld [vmem:[%s327_s3] ss:$0 sm:$0xff]  ;;  %vm71_vm1 = vcmask 64512   ;;  %vm154_vm2 = vcmask 523264  }
  0x14   :  { %188 = vset.pattern.permute.xlu0 %v240_v1  ;;  %v172_v4 = vld [vmem:[%s328_s4] ss:$0 sm:$0xff]  ;;  %v47_v5 = vmul.f32 %v171_v3, %v39_v2 }
  0x15   :  { %v57_v6 = vld [vmem:[%s326_s2] sm:$0xff]  ;;  %s241_s2 = smov [#allocation5]  }
  0x16   :  { %61 = vperm.xlu0 %188, %v57_v6   ;;  %v55_v7 = vadd.f32 %v172_v4, %v47_v5  ;;  %v56_v8 = vld [vmem:[#allocation2] sm:$0xff]  ;;  %s162_s21 = sshll.u32 %s241_s2, 4  ;;  %s163_s21 = int_to_ptr.vmem [resolvable:$true] %s162_s21 }
  0x17   :  { %v173_v9 = vld [vmem:[%s329_s5] ss:$0 sm:$0xff]  ;;  %s211_s22 = scalar_lea.vmem %s163_s21, 128  ;;  %p216_p9 = scmp.lt.s32.totalorder %s163_s21, %s163_s21 }
  0x18   :  { %179 = vmatpush3.msra.mxu0 %v55_v7  ;;  %v175_v13 = vld [vmem:[%s330_s6] ss:$0 sm:$0xff]  ;;  %p212_p8 = scmp.ne.s32.totalorder %s163_s21, %s211_s22  ;;  %p217_p10 = scmp.lt.s32.totalorder %s211_s22, %s211_s22 }
  0x19   :  { %181 = vmatmul.mubr.msk.f32.vlgmr.msra.gmra.mrb[0].mxu0 %vm71_vm1, %v56_v8 }
  0x1a   :  { %p218_p11 = por %p217_p10, %p216_p9 }
  0x1c   :  { %p219_p12 = pnand %p218_p11, %p212_p8 }
  0x95   :  { %v62_v10 = vpop.permute.xlu0 %61 }
  0x96   :  { %v70_v11 = vmul.f32 %v173_v9, %v62_v10 }
  0xec   :  { %v141_v12 = vpop.f32.mrb[0].mxu0 }
  0xed   :  { %v142_v14 = vadd.f32 %v141_v12, %v70_v11  ;;  %v182_v15 = vpop.f32.mrb[1].mxu0 }
  0xef   :  { %v152_v16 = vadd.f32 %v175_v13, %v142_v14 }
  0xf1   :  { %v153_v17 = vadd.f32 %v152_v16, %v39_v2 }
  0xf3   :  { %155 = vst.msk [vmem:[#allocation5] sm:$0xff] %vm154_vm2, %v153_v17 }
  0xf4   :  { %222 = shalt.err (!%p219_p12)
}
  0xf5   :  { %s223_s6 = scalar_lea.hbm %s331_s7, 128 }
  0xf6   :  { %p224_p13 = scmp.ne.s32.totalorder %s331_s7, %s223_s6  ;;  %p227_p0 = scmp.lt.u32.totalorder %s223_s6, %s331_s7 }
  0xf8   :  { %p229_p1 = pnand %p227_p0, %p224_p13 }
  0xfa   :  { %232 = shalt.err (!%p229_p1)
}
  0xfb   :  { %165 = dma.vmem_to_hbm [thread:$0]  %s163_s21, 128, %s331_s7, [#allocation4]  }
  0xfc   :  { %235 = dma.done.wait [#allocation4], 128  }
  0xfd   :  { %236 = vsyncadd [#allocation4], 4294967168 }
  0xfe   :  { %169 = vsyncpa [#allocation3], 1 }
  0xff   :  { %170 = vsyncpa [#allocation4], 1 }

</bundles_post_ra>
